<compile_context>
chip_gen: v5e
topology: v5e:2x2
jax: 0.10.0
libtpu: 0.0.40
codegen_flags: <defaults>
</compile_context>

<pallas_src>
import jax
import jax.numpy as jnp
from jax.experimental import pallas as pl
from jax.experimental.pallas import tpu as pltpu


def _round_up(x, m):
    return ((x + m - 1) // m) * m


def _ffn_kernel(x_ref, w1_ref, b1_ref, w2_ref, b2_ref, o_ref):
    # x_ref: (TILE_N, Dp), w1_ref: (Dp, Hp), b1_ref: (1, Hp),
    # w2_ref: (Hp, Dp),   b2_ref: (1, Dp), o_ref: (TILE_N, Dp)
    x = x_ref[...]
    h = jnp.dot(x, w1_ref[...], preferred_element_type=jnp.float32) + b1_ref[...]
    # SiLU in f32 (sigmoid goes to the EUP slot, multiply to the VPU).
    h = h * jax.nn.sigmoid(h)
    out = jnp.dot(h.astype(w2_ref.dtype), w2_ref[...],
                  preferred_element_type=jnp.float32) + b2_ref[...]
    o_ref[...] = out.astype(o_ref.dtype)


def feed_forward(x, w1, b1, w2, b2, *, tile_n=256):
    """x: (B, S, D). w1: (D, 2D), b1: (2D,), w2: (2D, D), b2: (D,).

    Weights are stored transposed w.r.t. PyTorch nn.Linear (i.e. (in, out))
    so the kernel computes plain `x @ W`.
    """
    B, S, D = x.shape
    H = w1.shape[1]  # 2 * D
    N = B * S
    x2d = x.reshape(N, D)

    # Pad feature dims to lane width (128) and token dim to a multiple of the tile.
    Dp = _round_up(D, 128)
    Hp = _round_up(H, 128)
    tile_n = min(tile_n, _round_up(N, 8))
    Np = _round_up(N, tile_n)

    x_p = jnp.pad(x2d, ((0, Np - N), (0, Dp - D)))
    w1_p = jnp.pad(w1, ((0, Dp - D), (0, Hp - H)))
    b1_p = jnp.pad(b1, (0, Hp - H)).reshape(1, Hp)
    w2_p = jnp.pad(w2, ((0, Hp - H), (0, Dp - D)))
    b2_p = jnp.pad(b2, (0, Dp - D)).reshape(1, Dp)

    grid = (pl.cdiv(Np, tile_n),)

    itemsize = x_p.dtype.itemsize
    flops = 2 * Np * Dp * Hp + 2 * Np * Hp * Dp          # two matmuls
    transcendentals = Np * Hp                             # sigmoid per hidden element
    bytes_accessed = (x_p.size + w1_p.size + b1_p.size +
                      w2_p.size + b2_p.size + Np * Dp) * itemsize

    out = pl.pallas_call(
        _ffn_kernel,
        out_shape=jax.ShapeDtypeStruct((Np, Dp), x.dtype),
        grid_spec=pltpu.PrefetchScalarGridSpec(
            num_scalar_prefetch=0,
            grid=grid,
            in_specs=[
                # streamed activations (double-buffered across the token grid)
                pl.BlockSpec((tile_n, Dp), lambda i: (i, 0)),
                # weights / biases: same block every step -> VMEM-resident
                pl.BlockSpec((Dp, Hp), lambda i: (0, 0)),
                pl.BlockSpec((1, Hp), lambda i: (0, 0)),
                pl.BlockSpec((Hp, Dp), lambda i: (0, 0)),
                pl.BlockSpec((1, Dp), lambda i: (0, 0)),
            ],
            out_specs=pl.BlockSpec((tile_n, Dp), lambda i: (i, 0)),
        ),
        compiler_params=pltpu.CompilerParams(
            dimension_semantics=("parallel",),
            vmem_limit_bytes=64 * 1024 * 1024,
        ),
        cost_estimate=pl.CostEstimate(
            flops=flops,
            transcendentals=transcendentals,
            bytes_accessed=bytes_accessed,
        ),
    )(x_p, w1_p, b1_p, w2_p, b2_p)

    return out[:N, :D].reshape(B, S, D)


def reference(x, w1, b1, w2, b2):
    h = jnp.dot(x, w1) + b1
    h = h * jax.nn.sigmoid(h)
    return jnp.dot(h, w2) + b2


if __name__ == "__main__":
    key = jax.random.PRNGKey(0)
    B, S, D = 2, 8, 32          # batch=2, seq=8, dim=32 -> hidden=64
    k_x, k_w1, k_b1, k_w2, k_b2 = jax.random.split(key, 5)

    x = jax.random.normal(k_x, (B, S, D), dtype=jnp.float32)

    # PyTorch nn.Linear stores (out, in); we keep them transposed as (in, out).
    bound1 = 1.0 / (D ** 0.5)
    w1 = jax.random.uniform(k_w1, (D, 2 * D), minval=-bound1, maxval=bound1,
                            dtype=jnp.float32)
    b1 = jax.random.uniform(k_b1, (2 * D,), minval=-bound1, maxval=bound1,
                            dtype=jnp.float32)
    bound2 = 1.0 / ((2 * D) ** 0.5)
    w2 = jax.random.uniform(k_w2, (2 * D, D), minval=-bound2, maxval=bound2,
                            dtype=jnp.float32)
    b2 = jax.random.uniform(k_b2, (D,), minval=-bound2, maxval=bound2,
                            dtype=jnp.float32)

    out = feed_forward(x, w1, b1, w2, b2)
    out = jax.block_until_ready(out)

    ref = reference(x, w1, b1, w2, b2)
    assert out.shape == (B, S, D)
    assert jnp.allclose(out, ref, atol=1e-5, rtol=1e-5), "mismatch vs reference"

    print("KERNEL_OK")
</pallas_src>

<mosaic_0001>
module attributes {stable_mosaic.version = 11 : i64} {
  func.func @_ffn_kernel(%arg0: i32, %arg1: memref<16x128xf32, #tpu.memory_space<vmem>>, %arg2: memref<128x128xf32, #tpu.memory_space<vmem>>, %arg3: memref<1x128xf32, #tpu.memory_space<vmem>>, %arg4: memref<128x128xf32, #tpu.memory_space<vmem>>, %arg5: memref<1x128xf32, #tpu.memory_space<vmem>>, %arg6: memref<16x128xf32, #tpu.memory_space<vmem>>) attributes {dimension_semantics = [#tpu.dimension_semantics<parallel>], iteration_bounds = array<i64: 1>, scalar_prefetch = 0 : i64, scratch_operands = 0 : i64, tpu.core_type = #tpu.core_type<tc>, window_params = [{transform_indices = @transform_0, window_bounds = array<i64: 16, 128>}, {pipeline_mode = #tpu.pipeline_mode<synchronous>, transform_indices = @transform_1, window_bounds = array<i64: 128, 128>}, {pipeline_mode = #tpu.pipeline_mode<synchronous>, transform_indices = @transform_2, window_bounds = array<i64: 1, 128>}, {pipeline_mode = #tpu.pipeline_mode<synchronous>, transform_indices = @transform_3, window_bounds = array<i64: 128, 128>}, {pipeline_mode = #tpu.pipeline_mode<synchronous>, transform_indices = @transform_4, window_bounds = array<i64: 1, 128>}, {transform_indices = @transform_5, window_bounds = array<i64: 16, 128>}]} {
    %c0 = arith.constant 0 : index
    %c0_0 = arith.constant 0 : index
    %0 = vector.load %arg1[%c0, %c0_0] : memref<16x128xf32, #tpu.memory_space<vmem>>, vector<16x128xf32>
    %c0_1 = arith.constant 0 : index
    %c0_2 = arith.constant 0 : index
    %1 = vector.load %arg2[%c0_1, %c0_2] : memref<128x128xf32, #tpu.memory_space<vmem>>, vector<128x128xf32>
    %cst = arith.constant dense<0.000000e+00> : vector<16x128xf32>
    %2 = tpu.matmul %0, %1, %cst {dimension_numbers = #tpu.dot_dimension_numbers<[1], [0], [0], [1], [0, 0, 1, 1], [], []>} : vector<16x128xf32>, vector<128x128xf32>, vector<16x128xf32> -> vector<16x128xf32>
    %c0_3 = arith.constant 0 : index
    %c0_4 = arith.constant 0 : index
    %3 = vector.load %arg3[%c0_3, %c0_4] : memref<1x128xf32, #tpu.memory_space<vmem>>, vector<1x128xf32>
    %4 = vector.broadcast %3 : vector<1x128xf32> to vector<16x128xf32>
    %5 = arith.addf %2, %4 : vector<16x128xf32>
    %6 = arith.negf %5 : vector<16x128xf32>
    %7 = math.exp %6 : vector<16x128xf32>
    %cst_5 = arith.constant 1.000000e+00 : f32
    %8 = vector.broadcast %cst_5 : f32 to vector<16x128xf32>
    %9 = arith.addf %8, %7 : vector<16x128xf32>
    %10 = arith.divf %8, %9 : vector<16x128xf32>
    %11 = arith.mulf %5, %10 : vector<16x128xf32>
    %c0_6 = arith.constant 0 : index
    %c0_7 = arith.constant 0 : index
    %12 = vector.load %arg4[%c0_6, %c0_7] : memref<128x128xf32, #tpu.memory_space<vmem>>, vector<128x128xf32>
    %cst_8 = arith.constant dense<0.000000e+00> : vector<16x128xf32>
    %13 = tpu.matmul %11, %12, %cst_8 {dimension_numbers = #tpu.dot_dimension_numbers<[1], [0], [0], [1], [0, 0, 1, 1], [], []>} : vector<16x128xf32>, vector<128x128xf32>, vector<16x128xf32> -> vector<16x128xf32>
    %c0_9 = arith.constant 0 : index
    %c0_10 = arith.constant 0 : index
    %14 = vector.load %arg5[%c0_9, %c0_10] : memref<1x128xf32, #tpu.memory_space<vmem>>, vector<1x128xf32>
    %15 = vector.broadcast %14 : vector<1x128xf32> to vector<16x128xf32>
    %16 = arith.addf %13, %15 : vector<16x128xf32>
    %c0_11 = arith.constant 0 : index
    %c0_12 = arith.constant 0 : index
    %17 = vector.load %arg6[%c0_11, %c0_12] : memref<16x128xf32, #tpu.memory_space<vmem>>, vector<16x128xf32>
    tpu.vector_store %arg6[%c0_11, %c0_12], %16 {strides = array<i32>} : memref<16x128xf32, #tpu.memory_space<vmem>>, vector<16x128xf32>,
    return
  }
  func.func @transform_0(%arg0: i32) -> (i32, i32) {
    %c0_i32 = arith.constant 0 : i32
    %c0_i32_0 = arith.constant 0 : i32
    return %arg0, %c0_i32 : i32, i32
  }
  func.func @transform_1(%arg0: i32) -> (i32, i32) {
    %c0_i32 = arith.constant 0 : i32
    %c0_i32_0 = arith.constant 0 : i32
    %c0_i32_1 = arith.constant 0 : i32
    return %c0_i32, %c0_i32_0 : i32, i32
  }
  func.func @transform_2(%arg0: i32) -> (i32, i32) {
    %c0_i32 = arith.constant 0 : i32
    %c0_i32_0 = arith.constant 0 : i32
    %c0_i32_1 = arith.constant 0 : i32
    return %c0_i32, %c0_i32_0 : i32, i32
  }
  func.func @transform_3(%arg0: i32) -> (i32, i32) {
    %c0_i32 = arith.constant 0 : i32
    %c0_i32_0 = arith.constant 0 : i32
    %c0_i32_1 = arith.constant 0 : i32
    return %c0_i32, %c0_i32_0 : i32, i32
  }
  func.func @transform_4(%arg0: i32) -> (i32, i32) {
    %c0_i32 = arith.constant 0 : i32
    %c0_i32_0 = arith.constant 0 : i32
    %c0_i32_1 = arith.constant 0 : i32
    return %c0_i32, %c0_i32_0 : i32, i32
  }
  func.func @transform_5(%arg0: i32) -> (i32, i32) {
    %c0_i32 = arith.constant 0 : i32
    %c0_i32_0 = arith.constant 0 : i32
    return %arg0, %c0_i32 : i32, i32
  }
}

</mosaic_0001>

<bundles_post_ra>
// kernel: tpu_custom_call.1
= control target key start
LH: loop header
LB: loop body
LE: loop exit
PB: predicated region body
PF: predicated region fallthrough
CT: control target
= control target key end

     0   :  { %10 = vsyncpa [#allocation3], 0  ;;  %s436_s0 = inlined_call_operand.hbm [shape: f32[16,128], index: 0, kind: input, shape index: {}]   ;;  %s437_s1 = inlined_call_operand.hbm [shape: f32[128,128], index: 1, kind: input, shape index: {}]   ;;  %s438_s2 = inlined_call_operand.vmem [shape: f32[1,128], index: 2, kind: input, shape index: {}]   ;;  %s439_s3 = inlined_call_operand.hbm [shape: f32[128,128], index: 3, kind: input, shape index: {}]   ;;  %s440_s4 = inlined_call_operand.vmem [shape: f32[1,128], index: 4, kind: input, shape index: {}]   ;;  %s441_s5 = inlined_call_operand.hbm [shape: f32[16,128], index: 5, kind: output, shape index: {}]  }
   0x1   :  { %11 = vsyncpa [#allocation6], 0 }
   0x2   :  { %12 = vsyncpa [#allocation4], 0  ;;  %s30_s20 = sshll.u32 %s437_s1, 4  ;;  %s370_s21 = smov [#allocation5]   ;;  %s31_s20 = int_to_ptr.hbm [resolvable:$true] %s30_s20 }
   0x3   :  { %s32_s22 = sshll.u32 %s370_s21, 4  ;;  %s17_s25 = sshll.u32 %s436_s0, 4  ;;  %s33_s22 = int_to_ptr.vmem [resolvable:$true] %s32_s22  ;;  %s18_s25 = int_to_ptr.hbm [resolvable:$true] %s17_s25 }
   0x4   :  { %s371_s26 = smov 128   ;;  %s372_s27 = smov 8  }
   0x5   :  { %38 = dma.hbm_to_vmem [thread:$0]  %s31_s20, 2048, %s33_s22, [#allocation6], %s371_s26, %s371_s26, %s372_s27  }
   0x6   :  { %s373_s28 = smov [#allocation2]   ;;  %s45_s1 = sshll.u32 %s439_s3, 4  ;;  %s46_s1 = int_to_ptr.hbm [resolvable:$true] %s45_s1 }
   0x7   :  { %s19_s29 = sshll.u32 %s373_s28, 4  ;;  %s374_s0 = smov [#allocation7]   ;;  %s20_s29 = int_to_ptr.vmem [resolvable:$true] %s19_s29 }
   0x8   :  { %25 = dma.hbm_to_vmem [thread:$0]  %s18_s25, 256, %s20_s29, [#allocation3], %s371_s26, %s371_s26, %s372_s27  }
   0x9   :  { %s47_s7 = sshll.u32 %s374_s0, 4  ;;  %s48_s7 = int_to_ptr.vmem [resolvable:$true] %s47_s7 }
   0xa   :  { %53 = dma.hbm_to_vmem [thread:$0]  %s46_s1, 2048, %s48_s7, [#allocation6], %s371_s26, %s371_s26, %s372_s27  }
   0xb   :  { %364 = dma.done.wait [#allocation3], 256  }
   0xc   :  { %365 = vsyncadd [#allocation3], 4294967040 }
   0xd   :  { %366 = dma.done.wait [#allocation6], 4096  }
   0xe   :  { %367 = vsyncadd [#allocation6], 4294963200  ;;  %v85_v0 = vld [vmem:[#allocation5 + $0x78] sm:$0xff]  ;;  %v84_v1 = vld [vmem:[#allocation5 + $0x70] sm:$0xff]  ;;  %s375_s10 = smov [#allocation8]   ;;  %s204_s14 = sshll.u32 %s441_s5, 4  ;;  %s205_s14 = int_to_ptr.hbm [resolvable:$true] %s204_s14 }
   0xf   :  { %90 = vmatpush.msra.mxu0 %v85_v0  ;;  %220 = vmatpush.msra.mxu2 %v85_v0  ;;  %v83_v2 = vld [vmem:[#allocation5 + $0x68] sm:$0xff]  ;;  %v82_v3 = vld [vmem:[#allocation5 + $0x60] sm:$0xff]  ;;  %v81_v4 = vld [vmem:[#allocation5 + $0x58] sm:$0xff]  ;;  %s202_s11 = sshll.u32 %s375_s10, 4  ;;  %s203_s11 = int_to_ptr.vmem [resolvable:$true] %s202_s11 }
  0x10   :  { %v80_v5 = vld [vmem:[#allocation5 + $0x50] sm:$0xff]  ;;  %v79_v6 = vld [vmem:[#allocation5 + $0x48] sm:$0xff]  ;;  %v78_v7 = vld [vmem:[#allocation5 + $0x40] sm:$0xff] }
  0x11   :  { %91 = vmatpush.msra.mxu0 %v84_v1  ;;  %221 = vmatpush.msra.mxu2 %v84_v1  ;;  %v77_v8 = vld [vmem:[#allocation5 + $0x38] sm:$0xff]  ;;  %v76_v9 = vld [vmem:[#allocation5 + $0x30] sm:$0xff]  ;;  %v75_v10 = vld [vmem:[#allocation5 + $0x28] sm:$0xff] }
  0x12   :  { %v74_v11 = vld [vmem:[#allocation5 + $0x20] sm:$0xff]  ;;  %v73_v12 = vld [vmem:[#allocation5 + $0x18] sm:$0xff]  ;;  %v72_v13 = vld [vmem:[#allocation5 + $0x10] sm:$0xff] }
  0x13   :  { %92 = vmatpush.msra.mxu0 %v83_v2  ;;  %222 = vmatpush.msra.mxu2 %v83_v2  ;;  %v71_v14 = vld [vmem:[#allocation5 + $0x8] sm:$0xff]  ;;  %v70_v15 = vld [vmem:[#allocation5] sm:$0xff]  ;;  %v68_v16 = vld [vmem:[#allocation2] sm:$0xff] }
  0x14   :  { %v69_v17 = vld [vmem:[#allocation2 + $0x8] sm:$0xff]  ;;  %v167_v19 = vld [vmem:[#allocation7 + $0x70] sm:$0xff]  ;;  %v166_v20 = vld [vmem:[#allocation7 + $0x68] sm:$0xff] }
  0x15   :  { %93 = vmatpush.msra.mxu0 %v82_v3  ;;  %223 = vmatpush.msra.mxu2 %v82_v3  ;;  %v168_v18 = vld [vmem:[#allocation7 + $0x78] sm:$0xff]  ;;  %v165_v21 = vld [vmem:[#allocation7 + $0x60] sm:$0xff]  ;;  %v163_v23 = vld [vmem:[#allocation7 + $0x50] sm:$0xff] }
  0x16   :  { %173 = vmatpush.msra.mxu1 %v168_v18  ;;  %236 = vmatpush.msra.mxu3 %v168_v18  ;;  %v164_v22 = vld [vmem:[#allocation7 + $0x58] sm:$0xff]  ;;  %v162_v24 = vld [vmem:[#allocation7 + $0x48] sm:$0xff]  ;;  %v161_v25 = vld [vmem:[#allocation7 + $0x40] sm:$0xff] }
  0x17   :  { %94 = vmatpush.msra.mxu0 %v81_v4  ;;  %224 = vmatpush.msra.mxu2 %v81_v4  ;;  %v160_v26 = vld [vmem:[#allocation7 + $0x38] sm:$0xff]  ;;  %v159_v27 = vld [vmem:[#allocation7 + $0x30] sm:$0xff]  ;;  %v158_v28 = vld [vmem:[#allocation7 + $0x28] sm:$0xff] }
  0x18   :  { %174 = vmatpush.msra.mxu1 %v167_v19  ;;  %237 = vmatpush.msra.mxu3 %v167_v19  ;;  %v157_v29 = vld [vmem:[#allocation7 + $0x20] sm:$0xff]  ;;  %v156_v30 = vld [vmem:[#allocation7 + $0x18] sm:$0xff]  ;;  %v155_v31 = vld [vmem:[#allocation7 + $0x10] sm:$0xff] }
  0x19   :  { %95 = vmatpush.msra.mxu0 %v80_v5  ;;  %225 = vmatpush.msra.mxu2 %v80_v5  ;;  %v154_v32 = vld [vmem:[#allocation7 + $0x8] sm:$0xff]  ;;  %v258_v33 = vld [vmem:[%s438_s2] ss:$0 sm:$0xff]  ;;  %v153_v34 = vld [vmem:[#allocation7] sm:$0xff] }
  0x1a   :  { %175 = vmatpush.msra.mxu1 %v166_v20  ;;  %238 = vmatpush.msra.mxu3 %v166_v20  ;;  %v259_v3 = vld [vmem:[%s440_s4] ss:$0 sm:$0xff] }
  0x1b   :  { %96 = vmatpush.msra.mxu0 %v79_v6  ;;  %226 = vmatpush.msra.mxu2 %v79_v6 }
  0x1c   :  { %176 = vmatpush.msra.mxu1 %v165_v21  ;;  %239 = vmatpush.msra.mxu3 %v165_v21 }
  0x1d   :  { %97 = vmatpush.msra.mxu0 %v78_v7  ;;  %227 = vmatpush.msra.mxu2 %v78_v7 }
  0x1e   :  { %177 = vmatpush.msra.mxu1 %v164_v22  ;;  %240 = vmatpush.msra.mxu3 %v164_v22 }
  0x1f   :  { %98 = vmatpush.msra.mxu0 %v77_v8  ;;  %228 = vmatpush.msra.mxu2 %v77_v8 }
  0x20   :  { %178 = vmatpush.msra.mxu1 %v163_v23  ;;  %241 = vmatpush.msra.mxu3 %v163_v23 }
  0x21   :  { %99 = vmatpush.msra.mxu0 %v76_v9  ;;  %229 = vmatpush.msra.mxu2 %v76_v9 }
  0x22   :  { %179 = vmatpush.msra.mxu1 %v162_v24  ;;  %242 = vmatpush.msra.mxu3 %v162_v24 }
  0x23   :  { %100 = vmatpush.msra.mxu0 %v75_v10  ;;  %230 = vmatpush.msra.mxu2 %v75_v10 }
  0x24   :  { %180 = vmatpush.msra.mxu1 %v161_v25  ;;  %243 = vmatpush.msra.mxu3 %v161_v25 }
  0x25   :  { %101 = vmatpush.msra.mxu0 %v74_v11  ;;  %231 = vmatpush.msra.mxu2 %v74_v11 }
  0x26   :  { %181 = vmatpush.msra.mxu1 %v160_v26  ;;  %244 = vmatpush.msra.mxu3 %v160_v26 }
  0x27   :  { %102 = vmatpush.msra.mxu0 %v73_v12  ;;  %232 = vmatpush.msra.mxu2 %v73_v12 }
  0x28   :  { %182 = vmatpush.msra.mxu1 %v159_v27  ;;  %245 = vmatpush.msra.mxu3 %v159_v27 }
  0x29   :  { %103 = vmatpush.msra.mxu0 %v72_v13  ;;  %233 = vmatpush.msra.mxu2 %v72_v13 }
  0x2a   :  { %183 = vmatpush.msra.mxu1 %v158_v28  ;;  %246 = vmatpush.msra.mxu3 %v158_v28 }
  0x2b   :  { %104 = vmatpush.msra.mxu0 %v71_v14  ;;  %234 = vmatpush.msra.mxu2 %v71_v14 }
  0x2c   :  { %184 = vmatpush.msra.mxu1 %v157_v29  ;;  %247 = vmatpush.msra.mxu3 %v157_v29 }
  0x2d   :  { %105 = vmatpush.msra.mxu0 %v70_v15  ;;  %235 = vmatpush.msra.mxu2 %v70_v15 }
  0x2e   :  { %106 = vmatmul.f32.vlgmr.msra.gmra.mxu0 %v68_v16  ;;  %109 = vmatmul.f32.vlgmr.msra.gmra.mxu2 %v69_v17 }
  0x2f   :  { %185 = vmatpush.msra.mxu1 %v156_v30  ;;  %248 = vmatpush.msra.mxu3 %v156_v30 }
  0x31   :  { %186 = vmatpush.msra.mxu1 %v155_v31  ;;  %249 = vmatpush.msra.mxu3 %v155_v31 }
  0x33   :  { %187 = vmatpush.msra.mxu1 %v154_v32  ;;  %250 = vmatpush.msra.mxu3 %v154_v32 }
  0x35   :  { %188 = vmatpush.msra.mxu1 %v153_v34  ;;  %251 = vmatpush.msra.mxu3 %v153_v34 }
  0xab   :  { %v107_v35 = vpop.f32.mrf.mxu0 }
  0xac   :  { %v108_v36 = vadd.f32 %v258_v33, %v107_v35 }
  0xae   :  { %v218_v37 = vmul.f32 -1.442695, %v108_v36 }
  0xb0   :  { %260 = vpow2.f32 %v218_v37 }
  0xb1   :  { %v110_v38 = vpop.f32.mrf.mxu2 }
  0xb2   :  { %v111_v39 = vadd.f32 %v258_v33, %v110_v38 }
  0xb4   :  { %v219_v40 = vmul.f32 -1.442695, %v111_v39 }
  0xb6   :  { %v261_v41 = vpop.eup %260  ;;  %262 = vpow2.f32 %v219_v40 }
  0xb7   :  { %v119_v42 = vadd.f32 1.0, %v261_v41 }
  0xb9   :  { %264 = vrcp.f32 %v119_v42  ;;  %v132_v47 = vand.u32 2147483648, %v119_v42  ;;  %vm126_vm0 = vweird.f32 %v119_v42  ;;  %v130_v49 = vand.u32 2147483647, %v119_v42 }
  0xbb   :  { %v133_v52 = vor.u32 1.1754944e-38, %v132_v47  ;;  %vm131_vm3 = vcmp.eq.f32.partialorder %v130_v49, 8.507059e+37 }
  0xbc   :  { %v263_v43 = vpop.eup %262 }
  0xbd   :  { %v120_v44 = vadd.f32 1.0, %v263_v43 }
  0xbf   :  { %v265_v45 = vpop.eup %264  ;;  %266 = vrcp.f32 %v120_v44  ;;  %v147_v58 = vand.u32 2147483648, %v120_v44  ;;  %v145_v61 = vand.u32 2147483647, %v120_v44  ;;  %vm141_vm5 = vweird.f32 %v120_v44 }
  0xc0   :  { %v122_v46 = vmul.f32 %v265_v45, %v119_v42  ;;  %vm127_vm1 = vweird.f32 %v265_v45 }
  0xc1   :  { %vm128_vm2 = vmor %vm126_vm0, %vm127_vm1  ;;  %v148_v63 = vor.u32 1.1754944e-38, %v147_v58  ;;  %vm146_vm7 = vcmp.eq.f32.partialorder %v145_v61, 8.507059e+37 }
  0xc2   :  { %v123_v48 = vsub.f32 1.0, %v122_v46 }
  0xc4   :  { %v124_v50 = vmul.f32 %v265_v45, %v123_v48 }
  0xc5   :  { %v267_v51 = vpop.eup %266 }
  0xc6   :  { %v125_v53 = vadd.f32 %v265_v45, %v124_v50  ;;  %v137_v54 = vmul.f32 %v267_v51, %v120_v44  ;;  %vm142_vm4 = vweird.f32 %v267_v51 }
  0xc7   :  { %vm143_vm6 = vmor %vm141_vm5, %vm142_vm4 }
  0xc8   :  { %v129_v55 = vsel %vm128_vm2, %v265_v45, %v125_v53  ;;  %v138_v56 = vsub.f32 1.0, %v137_v54 }
  0xc9   :  { %v134_v57 = vsel %vm131_vm3, %v133_v52, %v129_v55 }
  0xca   :  { %v151_v59 = vmul.f32 %v134_v57, %v108_v36  ;;  %v139_v60 = vmul.f32 %v267_v51, %v138_v56 }
  0xcc   :  { %189 = vmatmul.f32.vlgmr.msra.gmra.mxu1 %v151_v59  ;;  %v140_v62 = vadd.f32 %v267_v51, %v139_v60 }
  0xce   :  { %v144_v0 = vsel %vm143_vm6, %v267_v51, %v140_v62 }
  0xcf   :  { %v149_v1 = vsel %vm146_vm7, %v148_v63, %v144_v0 }
  0xd0   :  { %v152_v2 = vmul.f32 %v149_v1, %v111_v39 }
  0xd2   :  { %192 = vmatmul.f32.vlgmr.msra.gmra.mxu3 %v152_v2 }
 0x149   :  { %v190_v4 = vpop.f32.mrf.mxu1 }
 0x14a   :  { %v191_v5 = vadd.f32 %v259_v3, %v190_v4 }
 0x14c   :  { %196 = vst [vmem:[#allocation8] sm:$0xff] %v191_v5 }
 0x155   :  { %v193_v6 = vpop.f32.mrf.mxu3 }
 0x156   :  { %v194_v7 = vadd.f32 %v259_v3, %v193_v6 }
 0x158   :  { %197 = vst [vmem:[#allocation8 + $0x8] sm:$0xff] %v194_v7 }
 0x159   :  { %210 = dma.vmem_to_hbm [thread:$0]  %s203_s11, 256, %s205_s14, [#allocation4], %s371_s26, %s371_s26, %s372_s27  }
 0x15a   :  { %368 = dma.done.wait [#allocation4], 256  }
 0x15b   :  { %369 = vsyncadd [#allocation4], 4294967040 }
 0x15c   :  { %215 = vsyncpa [#allocation3], 1 }
 0x15d   :  { %216 = vsyncpa [#allocation6], 1 }
 0x15e   :  { %217 = vsyncpa [#allocation4], 1 }

</bundles_post_ra>
